<compile_context>
chip_gen: v7x
topology: tpu7x:2x2x1
jax: 0.10.0
libtpu: 0.0.40
codegen_flags: <defaults>
</compile_context>

<pallas_src>
import functools
import math

import jax
import jax.numpy as jnp
import numpy as np
from jax.experimental import pallas as pl
from jax.experimental.pallas import tpu as pltpu


# -----------------------------------------------------------------------------
# Pallas kernels
# -----------------------------------------------------------------------------
def _kqv_proj_kernel(x_ref, w_ref, b_ref, o_ref):
    # y = x @ [Wk^T | Wq^T | Wv^T] + [bk | bq | bv]   (single wide MXU matmul)
    o_ref[...] = (
        jnp.dot(x_ref[...], w_ref[...], preferred_element_type=jnp.float32)
        + b_ref[...]
    )


def _attn_out_kernel(q_ref, k_ref, v_ref, att_ref, msg_ref, x_ref,
                     awt_ref, ab_ref, alpha_ref, o_ref, acc_ref,
                     *, n_heads, d_k, num_rel):
    # Grid = (row tiles ["parallel"], relations ["arbitrary"]).
    r = pl.program_id(1)

    @pl.when(r == 0)
    def _init():
        acc_ref[...] = jnp.zeros_like(acc_ref)

    q = q_ref[...]          # (TM, D)   D = n_heads * d_k
    k = k_ref[0]            # (Ns, D)
    v = v_ref[0]            # (Ns, D)

    # All heads batched into one lane-dense block-diagonal matmul
    # (contraction width = D, not d_k); relation_pri / sqrt_dk is already
    # folded into att_ref on the host.
    key = jnp.dot(k, att_ref[0], preferred_element_type=jnp.float32)    # (Ns, D)
    msg = jnp.dot(v, msg_ref[0], preferred_element_type=jnp.float32)    # (Ns, D)

    # Per-head score / softmax / PV.  The d_k-wide contraction is intrinsic to
    # the algorithm; dot_general consumes `key` directly (no explicit .T).
    contract_last = (((1,), (1,)), ((), ()))
    head_outs = []
    for h in range(n_heads):                      # static unroll, n_heads small
        lo, hi = h * d_k, (h + 1) * d_k
        score = jax.lax.dot_general(
            q[:, lo:hi], key[:, lo:hi], contract_last,
            preferred_element_type=jnp.float32)                         # (TM, Ns)
        m = jnp.max(score, axis=-1, keepdims=True)
        e = jnp.exp(score - m)
        denom = jnp.sum(e, axis=-1, keepdims=True)
        attw = e * pl.reciprocal(denom)           # reciprocal instead of divide
        head_outs.append(
            jnp.dot(attw, msg[:, lo:hi], preferred_element_type=jnp.float32))
    acc_ref[...] += jnp.concatenate(head_outs, axis=-1)                 # (TM, D)

    # Epilogue on the last relation: cross-relation mean, a_linear projection,
    # skip gate — all without leaving VMEM.
    @pl.when(r == num_rel - 1)
    def _finalize():
        t_mean = acc_ref[...] * (1.0 / num_rel)
        trans = (jnp.dot(t_mean, awt_ref[...], preferred_element_type=jnp.float32)
                 + ab_ref[...])
        alpha = alpha_ref[...]                    # (1, 1), broadcasts
        o_ref[...] = trans * alpha + x_ref[...] * (1.0 - alpha)


# -----------------------------------------------------------------------------
# Wrappers around pallas_call
# -----------------------------------------------------------------------------
def _row_tile(n):
    # Largest convenient row tile; fall back to a full-extent block.
    for t in (512, 256, 128):
        if n % t == 0:
            return t
    return n


def fused_kqv_projection(x, w_kqv_t, b_kqv):
    n, din = x.shape
    d3 = w_kqv_t.shape[1]
    tm = _row_tile(n)
    return pl.pallas_call(
        _kqv_proj_kernel,
        out_shape=jax.ShapeDtypeStruct((n, d3), jnp.float32),
        grid_spec=pltpu.PrefetchScalarGridSpec(
            num_scalar_prefetch=0,
            grid=(n // tm,),
            in_specs=[
                pl.BlockSpec((tm, din), lambda i: (i, 0)),
                pl.BlockSpec((din, d3), lambda i: (0, 0)),
                pl.BlockSpec((1, d3), lambda i: (0, 0)),
            ],
            out_specs=pl.BlockSpec((tm, d3), lambda i: (i, 0)),
        ),
        compiler_params=pltpu.CompilerParams(
            dimension_semantics=("parallel",)),
    )(x, w_kqv_t, b_kqv)


def fused_attention_output(q, k_stack, v_stack, att_stack, msg_stack,
                           x, a_wt, a_b, alpha, *, n_heads, d_k):
    """Per-relation attention + cross-relation mean + skip-gated a_linear,
    fused in one pallas_call for one destination node type."""
    num_rel, ns, d = k_stack.shape
    nd, din = x.shape
    tm = _row_tile(nd)
    kernel = functools.partial(_attn_out_kernel, n_heads=n_heads, d_k=d_k,
                               num_rel=num_rel)
    return pl.pallas_call(
        kernel,
        out_shape=jax.ShapeDtypeStruct((nd, d), jnp.float32),
        grid_spec=pltpu.PrefetchScalarGridSpec(
            num_scalar_prefetch=0,
            grid=(nd // tm, num_rel),                 # reduction axis last
            in_specs=[
                pl.BlockSpec((tm, d), lambda i, r: (i, 0)),         # q (dst)
                pl.BlockSpec((1, ns, d), lambda i, r: (r, 0, 0)),   # k (src, per rel)
                pl.BlockSpec((1, ns, d), lambda i, r: (r, 0, 0)),   # v (src, per rel)
                pl.BlockSpec((1, d, d), lambda i, r: (r, 0, 0)),    # block-diag att (pre-scaled)
                pl.BlockSpec((1, d, d), lambda i, r: (r, 0, 0)),    # block-diag msg
                pl.BlockSpec((tm, din), lambda i, r: (i, 0)),       # x (skip)
                pl.BlockSpec((d, d), lambda i, r: (0, 0)),          # a_lin W^T
                pl.BlockSpec((1, d), lambda i, r: (0, 0)),          # a_lin bias
                pl.BlockSpec((1, 1), lambda i, r: (0, 0)),          # alpha
            ],
            out_specs=pl.BlockSpec((tm, d), lambda i, r: (i, 0)),
            scratch_shapes=[pltpu.VMEM((tm, d), jnp.float32)],      # mean accumulator
        ),
        compiler_params=pltpu.CompilerParams(
            dimension_semantics=("parallel", "arbitrary"),
            vmem_limit_bytes=32 * 1024 * 1024,
        ),
    )(q, k_stack, v_stack, att_stack, msg_stack, x, a_wt, a_b, alpha)


def _block_diag(blocks):
    # blocks: (H, dk, dk) -> (H*dk, H*dk) block-diagonal (host side, tiny)
    h, dk, _ = blocks.shape
    out = jnp.zeros((h * dk, h * dk), jnp.float32)
    for i in range(h):
        out = out.at[i * dk:(i + 1) * dk, i * dk:(i + 1) * dk].set(blocks[i])
    return out


# -----------------------------------------------------------------------------
# HGT layer (parameters + forward) built on the kernels above
# -----------------------------------------------------------------------------
class HGTLayerPallas:
    def __init__(self, key, in_dim, out_dim, num_types, num_relations, n_heads):
        assert out_dim % n_heads == 0
        assert in_dim == out_dim, "skip connection requires in_dim == out_dim"
        self.in_dim, self.out_dim = in_dim, out_dim
        self.num_types, self.num_relations = num_types, num_relations
        self.n_heads = n_heads
        self.d_k = out_dim // n_heads
        self.sqrt_dk = math.sqrt(self.d_k)

        keys = jax.random.split(key, 4 * num_types + 2)
        ki = iter(range(len(keys)))

        def lin_init(k, dout, din):
            bound = 1.0 / math.sqrt(din)
            kw, kb = jax.random.split(k)
            w = jax.random.uniform(kw, (dout, din), jnp.float32, -bound, bound)
            b = jax.random.uniform(kb, (dout,), jnp.float32, -bound, bound)
            return w, b

        self.k_lin = [lin_init(keys[next(ki)], out_dim, in_dim) for _ in range(num_types)]
        self.q_lin = [lin_init(keys[next(ki)], out_dim, in_dim) for _ in range(num_types)]
        self.v_lin = [lin_init(keys[next(ki)], out_dim, in_dim) for _ in range(num_types)]
        self.a_lin = [lin_init(keys[next(ki)], out_dim, out_dim) for _ in range(num_types)]

        xav = math.sqrt(6.0 / (self.d_k + self.d_k))
        self.relation_att = jax.random.uniform(
            keys[next(ki)], (num_relations, n_heads, self.d_k, self.d_k),
            jnp.float32, -xav, xav)
        self.relation_msg = jax.random.uniform(
            keys[next(ki)], (num_relations, n_heads, self.d_k, self.d_k),
            jnp.float32, -xav, xav)
        self.relation_pri = jnp.ones((num_relations, n_heads), jnp.float32)
        self.skip = jnp.ones((num_types,), jnp.float32)

    # ------------------------------------------------------------------ forward
    def forward(self, node_feats, canonical_etypes):
        """node_feats: list of (N_t, in_dim) arrays, one per node type.
        canonical_etypes: list of (src_type_id, rel_id, dst_type_id) with
        dense (all-to-all) edges per relation."""
        H, dk, D = self.n_heads, self.d_k, self.out_dim
        f32 = jnp.float32

        # --- fused k/q/v projection: one pallas_call per node type -----------
        k_proj, q_proj, v_proj = [], [], []
        for t, x in enumerate(node_feats):
            w_kqv_t = jnp.concatenate(
                [self.k_lin[t][0].T, self.q_lin[t][0].T, self.v_lin[t][0].T], axis=1)
            b_kqv = jnp.concatenate(
                [self.k_lin[t][1], self.q_lin[t][1], self.v_lin[t][1]]
            ).reshape(1, 3 * D)
            kqv = fused_kqv_projection(x.astype(f32), w_kqv_t.astype(f32),
                                       b_kqv.astype(f32))
            k_proj.append(kqv[:, :D])
            q_proj.append(kqv[:, D:2 * D])
            v_proj.append(kqv[:, 2 * D:])

        # --- host-side (tiny) pre-scaled block-diagonal relation weights -----
        scale = (self.relation_pri / self.sqrt_dk)[:, :, None, None]
        att_scaled = self.relation_att * scale
        att_bd = jnp.stack([_block_diag(att_scaled[r]) for r in range(self.num_relations)])
        msg_bd = jnp.stack([_block_diag(self.relation_msg[r]) for r in range(self.num_relations)])

        # --- group relations by destination node type ------------------------
        rels_per_dst = {t: [] for t in range(self.num_types)}
        for (src_t, rel, dst_t) in canonical_etypes:
            rels_per_dst[dst_t].append((src_t, rel))

        outs = []
        for t, x in enumerate(node_feats):
            rels = rels_per_dst[t]
            if not rels:
                outs.append(x)   # matches PyTorch: 't' never written for this type
                continue
            # TODO(synk): pad + mask the src axis to support relations with
            # differing source-node counts targeting the same dst type.
            src_counts = {k_proj[s].shape[0] for (s, _) in rels}
            assert len(src_counts) == 1

            k_stack = jnp.stack([k_proj[s] for (s, _) in rels])     # (R, Ns, D)
            v_stack = jnp.stack([v_proj[s] for (s, _) in rels])
            att_stack = jnp.stack([att_bd[r] for (_, r) in rels])   # (R, D, D)
            msg_stack = jnp.stack([msg_bd[r] for (_, r) in rels])
            alpha = jax.nn.sigmoid(self.skip[t]).reshape(1, 1).astype(f32)

            outs.append(fused_attention_output(
                q_proj[t], k_stack, v_stack, att_stack, msg_stack,
                x.astype(f32),
                self.a_lin[t][0].T.astype(f32),
                self.a_lin[t][1].reshape(1, D).astype(f32),
                alpha, n_heads=H, d_k=dk))
        return outs

    # ------------------------------------------------------------- pure-JAX ref
    def reference(self, node_feats, canonical_etypes):
        H, dk = self.n_heads, self.d_k
        k_proj, q_proj, v_proj = [], [], []
        for t, x in enumerate(node_feats):
            n = x.shape[0]
            k_proj.append((x @ self.k_lin[t][0].T + self.k_lin[t][1]).reshape(n, H, dk))
            q_proj.append((x @ self.q_lin[t][0].T + self.q_lin[t][1]).reshape(n, H, dk))
            v_proj.append((x @ self.v_lin[t][0].T + self.v_lin[t][1]).reshape(n, H, dk))
        per_type_msgs = {t: [] for t in range(self.num_types)}
        for (src_t, rel, dst_t) in canonical_etypes:
            k, q, v = k_proj[src_t], q_proj[dst_t], v_proj[src_t]
            key = jnp.einsum("shd,hde->she", k, self.relation_att[rel])
            score = jnp.einsum("qhe,she->qsh", q, key)
            score = score * self.relation_pri[rel][None, None, :] / self.sqrt_dk
            attw = jax.nn.softmax(score, axis=1)
            msg = jnp.einsum("shd,hde->she", v, self.relation_msg[rel])
            t_r = jnp.einsum("qsh,she->qhe", attw, msg).reshape(q.shape[0], H * dk)
            per_type_msgs[dst_t].append(t_r)
        outs = []
        for t, x in enumerate(node_feats):
            if not per_type_msgs[t]:
                outs.append(x)
                continue
            t_mean = jnp.mean(jnp.stack(per_type_msgs[t], axis=0), axis=0)
            alpha = jax.nn.sigmoid(self.skip[t])
            trans = t_mean @ self.a_lin[t][0].T + self.a_lin[t][1]
            outs.append(trans * alpha + x * (1.0 - alpha))
        return outs


# -----------------------------------------------------------------------------
# Main
# -----------------------------------------------------------------------------
if __name__ == "__main__":
    in_dim = out_dim = 128          # lane-dense feature dim; skip needs in==out
    n_heads = 4                     # d_k = 32
    num_types = 2
    num_relations = 3
    n_nodes = [32, 32]              # nodes per type (small demo)

    key = jax.random.PRNGKey(0)
    k_params, k0, k1 = jax.random.split(key, 3)

    layer = HGTLayerPallas(k_params, in_dim, out_dim, num_types,
                           num_relations, n_heads)

    x0 = jax.random.normal(k0, (n_nodes[0], in_dim), jnp.float32)
    x1 = jax.random.normal(k1, (n_nodes[1], in_dim), jnp.float32)
    node_feats = [x0, x1]

    # canonical etypes: (src_type, relation_id, dst_type), dense edges each
    canonical_etypes = [
        (0, 0, 1),   # type0 -> type1
        (1, 1, 0),   # type1 -> type0
        (0, 2, 0),   # type0 -> type0 (dst type0 exercises cross_reducer mean)
    ]

    outs = layer.forward(node_feats, canonical_etypes)
    outs = [jax.block_until_ready(o) for o in outs]

    refs = layer.reference(node_feats, canonical_etypes)
    for o, r in zip(outs, refs):
        np.testing.assert_allclose(np.asarray(o), np.asarray(r),
                                   rtol=1e-4, atol=1e-4)

    print("KERNEL_OK")
</pallas_src>

<mosaic_0001>
module attributes {stable_mosaic.version = 11 : i64} {
  func.func @_kqv_proj_kernel(%arg0: i32, %arg1: memref<32x128xf32, #tpu.memory_space<vmem>>, %arg2: memref<128x384xf32, #tpu.memory_space<vmem>>, %arg3: memref<1x384xf32, #tpu.memory_space<vmem>>, %arg4: memref<32x384xf32, #tpu.memory_space<vmem>>) attributes {dimension_semantics = [#tpu.dimension_semantics<parallel>], iteration_bounds = array<i64: 1>, scalar_prefetch = 0 : i64, scratch_operands = 0 : i64, tpu.core_type = #tpu.core_type<tc>, window_params = [{transform_indices = @transform_0, window_bounds = array<i64: 32, 128>}, {pipeline_mode = #tpu.pipeline_mode<synchronous>, transform_indices = @transform_1, window_bounds = array<i64: 128, 384>}, {pipeline_mode = #tpu.pipeline_mode<synchronous>, transform_indices = @transform_2, window_bounds = array<i64: 1, 384>}, {transform_indices = @transform_3, window_bounds = array<i64: 32, 384>}]} {
    %c0 = arith.constant 0 : index
    %c0_0 = arith.constant 0 : index
    %0 = vector.load %arg1[%c0, %c0_0] : memref<32x128xf32, #tpu.memory_space<vmem>>, vector<32x128xf32>
    %c0_1 = arith.constant 0 : index
    %c0_2 = arith.constant 0 : index
    %1 = vector.load %arg2[%c0_1, %c0_2] : memref<128x384xf32, #tpu.memory_space<vmem>>, vector<128x384xf32>
    %cst = arith.constant dense<0.000000e+00> : vector<32x384xf32>
    %2 = tpu.matmul %0, %1, %cst {dimension_numbers = #tpu.dot_dimension_numbers<[1], [0], [0], [1], [0, 0, 1, 1], [], []>} : vector<32x128xf32>, vector<128x384xf32>, vector<32x384xf32> -> vector<32x384xf32>
    %c0_3 = arith.constant 0 : index
    %c0_4 = arith.constant 0 : index
    %3 = vector.load %arg3[%c0_3, %c0_4] : memref<1x384xf32, #tpu.memory_space<vmem>>, vector<1x384xf32>
    %4 = vector.broadcast %3 : vector<1x384xf32> to vector<32x384xf32>
    %5 = arith.addf %2, %4 : vector<32x384xf32>
    %c0_5 = arith.constant 0 : index
    %c0_6 = arith.constant 0 : index
    %6 = vector.load %arg4[%c0_5, %c0_6] : memref<32x384xf32, #tpu.memory_space<vmem>>, vector<32x384xf32>
    tpu.vector_store %arg4[%c0_5, %c0_6], %5 {strides = array<i32>} : memref<32x384xf32, #tpu.memory_space<vmem>>, vector<32x384xf32>,
    return
  }
  func.func @transform_0(%arg0: i32) -> (i32, i32) {
    %c0_i32 = arith.constant 0 : i32
    %c0_i32_0 = arith.constant 0 : i32
    return %arg0, %c0_i32 : i32, i32
  }
  func.func @transform_1(%arg0: i32) -> (i32, i32) {
    %c0_i32 = arith.constant 0 : i32
    %c0_i32_0 = arith.constant 0 : i32
    %c0_i32_1 = arith.constant 0 : i32
    return %c0_i32, %c0_i32_0 : i32, i32
  }
  func.func @transform_2(%arg0: i32) -> (i32, i32) {
    %c0_i32 = arith.constant 0 : i32
    %c0_i32_0 = arith.constant 0 : i32
    %c0_i32_1 = arith.constant 0 : i32
    return %c0_i32, %c0_i32_0 : i32, i32
  }
  func.func @transform_3(%arg0: i32) -> (i32, i32) {
    %c0_i32 = arith.constant 0 : i32
    %c0_i32_0 = arith.constant 0 : i32
    return %arg0, %c0_i32 : i32, i32
  }
}

</mosaic_0001>

<bundles_post_ra>
// kernel: tpu_custom_call.1
= control target key start
LH: loop header
LB: loop body
LE: loop exit
PB: predicated region body
PF: predicated region fallthrough
CT: control target
= control target key end

     0   :  { %8 = vsyncpa [#allocation3], 0  ;;  %s595_s0 = inlined_call_operand.hbm [shape: f32[32,128], index: 0, kind: input, shape index: {}]   ;;  %s596_s1 = inlined_call_operand.hbm [shape: f32[128,384], index: 1, kind: input, shape index: {}]   ;;  %s597_s2 = inlined_call_operand.vmem [shape: f32[1,384], index: 2, kind: input, shape index: {}]   ;;  %s598_s3 = inlined_call_operand.hbm [shape: f32[32,384], index: 3, kind: output, shape index: {}]  }
   0x1   :  { %9 = vsyncpa [#allocation6], 0 }
   0x2   :  { %10 = vsyncpa [#allocation4], 0  ;;  %s518_s12 = smov [#allocation2]   ;;  %s446_s16 = scalar_lea.hbm %s595_s0, 512 }
   0x3   :  { %s16_s13 = sshll.u32 %s518_s12, 4  ;;  %p447_p0 = scmp.ne.s32.totalorder %s595_s0, %s446_s16  ;;  %s17_s13 = int_to_ptr.vmem [resolvable:$true] %s16_s13 }
   0x4   :  { %p450_p1 = scmp.lt.u32.totalorder %s446_s16, %s595_s0 }
   0x6   :  { %p452_p2 = pnand %p450_p1, %p447_p0 }
   0x8   :  { %455 = shalt.err (!%p452_p2)
}
   0x9   :  { %s456_s21 = scalar_lea.vmem %s17_s13, 512  ;;  %p461_p4 = scmp.lt.s32.totalorder %s17_s13, %s17_s13 }
   0xa   :  { %p457_p3 = scmp.ne.s32.totalorder %s17_s13, %s456_s21  ;;  %p462_p5 = scmp.lt.s32.totalorder %s456_s21, %s456_s21 }
   0xc   :  { %p463_p6 = por %p462_p5, %p461_p4 }
   0xe   :  { %p464_p7 = pnand %p463_p6, %p457_p3 }
  0x10   :  { %467 = shalt.err (!%p464_p7)
}
  0x11   :  { %s519_s22 = smov 128   ;;  %s520_s23 = smov 8  }
  0x12   :  { %22 = dma.hbm_to_vmem [thread:$0]  %s595_s0, 512, %s17_s13, [#allocation3], %s519_s22, %s519_s22, %s520_s23  }
  0x13   :  { %s521_s26 = smov [#allocation5]   ;;  %s468_s30 = scalar_lea.hbm %s596_s1, 6144 }
  0x14   :  { %s28_s27 = sshll.u32 %s521_s26, 4  ;;  %p469_p8 = scmp.ne.s32.totalorder %s596_s1, %s468_s30  ;;  %s29_s27 = int_to_ptr.vmem [resolvable:$true] %s28_s27 }
  0x15   :  { %p472_p9 = scmp.lt.u32.totalorder %s468_s30, %s596_s1 }
  0x17   :  { %p474_p10 = pnand %p472_p9, %p469_p8 }
  0x19   :  { %477 = shalt.err (!%p474_p10)
}
  0x1a   :  { %s478_s8 = scalar_lea.vmem %s29_s27, 6144  ;;  %p483_p12 = scmp.lt.s32.totalorder %s29_s27, %s29_s27 }
  0x1b   :  { %p479_p11 = scmp.ne.s32.totalorder %s29_s27, %s478_s8  ;;  %p484_p13 = scmp.lt.s32.totalorder %s478_s8, %s478_s8 }
  0x1d   :  { %p485_p0 = por %p484_p13, %p483_p12 }
  0x1f   :  { %p486_p1 = pnand %p485_p0, %p479_p11 }
  0x21   :  { %489 = shalt.err (!%p486_p1)
}
  0x22   :  { %s522_s0 = smov 384   ;;  %s523_s9 = smov 24  }
  0x23   :  { %34 = dma.hbm_to_vmem [thread:$0]  %s596_s1, 6144, %s29_s27, [#allocation6], %s522_s0, %s522_s0, %s523_s9  }
  0x24   :  { %512 = dma.done.wait [#allocation3], 512  }
  0x25   :  { %513 = vsyncadd [#allocation3], 4294966784 }
  0x26   :  { %514 = dma.done.wait [#allocation6], 6144  }
  0x27   :  { %515 = vsyncadd [#allocation6], 4294961152  ;;  %v524_v0 = vmov 0.0   ;;  %v48_v1 = vld [vmem:[#allocation5 + $0x8] sm:$0xff]  ;;  %v51_v2 = vld [vmem:[#allocation5 + $0x20] sm:$0xff] }
  0x28   :  { %176 = vmatprep.mubr.f32.mxu0 %v524_v0  ;;  %v47_v3 = vld [vmem:[#allocation5] sm:$0xff]  ;;  %v374_v4 = vpack.c.bf16 %v51_v2, %v48_v1  ;;  %v50_v5 = vld [vmem:[#allocation5 + $0x18] sm:$0xff]  ;;  %v57_v7 = vld [vmem:[#allocation5 + $0x50] sm:$0xff] }
  0x29   :  { %v54_v6 = vld [vmem:[#allocation5 + $0x38] sm:$0xff]  ;;  %v376_v8 = vpack.c.bf16 %v50_v5, %v47_v3  ;;  %v53_v10 = vld [vmem:[#allocation5 + $0x30] sm:$0xff]  ;;  %v56_v11 = vld [vmem:[#allocation5 + $0x48] sm:$0xff] }
  0x2a   :  { %v378_v9 = vpack.c.bf16 %v57_v7, %v54_v6  ;;  %v49_v12 = vld [vmem:[#allocation5 + $0x10] sm:$0xff]  ;;  %375 = vmatprep.subr.bf16.mxu0 %v374_v4  ;;  %v52_v13 = vld [vmem:[#allocation5 + $0x28] sm:$0xff]  ;;  %v63_v15 = vld [vmem:[#allocation5 + $0x80] sm:$0xff]  ;;  %v380_v16 = vpack.c.bf16 %v56_v11, %v53_v10 }
  0x2b   :  { %v60_v14 = vld [vmem:[#allocation5 + $0x68] sm:$0xff]  ;;  %377 = vmatpush1.bf16.msra.mxu0 %v376_v8  ;;  %v406_v17 = vpack.c.bf16 %v52_v13, %v49_v12  ;;  %v55_v18 = vld [vmem:[#allocation5 + $0x40] sm:$0xff]  ;;  %v62_v21 = vld [vmem:[#allocation5 + $0x78] sm:$0xff] }
  0x2c   :  { %379 = vmatprep.subr.bf16.mxu0 %v378_v9  ;;  %v382_v19 = vpack.c.bf16 %v63_v15, %v60_v14  ;;  %v59_v20 = vld [vmem:[#allocation5 + $0x60] sm:$0xff]  ;;  %v58_v22 = vld [vmem:[#allocation5 + $0x58] sm:$0xff]  ;;  %v69_v25 = vld [vmem:[#allocation5 + $0xb0] sm:$0xff]  ;;  %v97_v14 = vlaneseq }
  0x2d   :  { %407 = vmatprep.subr.bf16.mxu1 %v406_v17  ;;  %v410_v23 = vpack.c.bf16 %v58_v22, %v55_v18  ;;  %v66_v24 = vld [vmem:[#allocation5 + $0x98] sm:$0xff]  ;;  %v61_v26 = vld [vmem:[#allocation5 + $0x70] sm:$0xff]  ;;  %v64_v27 = vld [vmem:[#allocation5 + $0x88] sm:$0xff]  ;;  %v384_v28 = vpack.c.bf16 %v62_v21, %v59_v20 }
  0x2e   :  { %409 = vmatpush3.bf16.msra.mxu1 %v406_v17  ;;  %v65_v29 = vld [vmem:[#allocation5 + $0x90] sm:$0xff]  ;;  %v414_v30 = vpack.c.bf16 %v64_v27, %v61_v26  ;;  %v386_v31 = vpack.c.bf16 %v69_v25, %v66_v24  ;;  %v68_v32 = vld [vmem:[#allocation5 + $0xa8] sm:$0xff]  ;;  %v67_v33 = vld [vmem:[#allocation5 + $0xa0] sm:$0xff]  ;;  %v98_v15 = vshrl.u32 %v97_v14, 7 }
  0x2f   :  { %381 = vmatpush1.bf16.msra.mxu0 %v380_v16  ;;  %411 = vmatprep.subr.bf16.mxu1 %v410_v23  ;;  %v70_v34 = vld [vmem:[#allocation5 + $0xb8] sm:$0xff]  ;;  %v72_v35 = vld [vmem:[#allocation5 + $0xc8] sm:$0xff]  ;;  %v75_v36 = vld [vmem:[#allocation5 + $0xe0] sm:$0xff]  ;;  %v388_v37 = vpack.c.bf16 %v68_v32, %v65_v29 }
  0x30   :  { %383 = vmatprep.subr.bf16.mxu0 %v382_v19  ;;  %v71_v38 = vld [vmem:[#allocation5 + $0xc0] sm:$0xff]  ;;  %v418_v39 = vpack.c.bf16 %v70_v34, %v67_v33  ;;  %v390_v40 = vpack.c.bf16 %v75_v36, %v72_v35  ;;  %v74_v41 = vld [vmem:[#allocation5 + $0xd8] sm:$0xff]  ;;  %v73_v42 = vld [vmem:[#allocation5 + $0xd0] sm:$0xff]  ;;  %v99_v16 = vsub.s32 0, %v98_v15  ;;  %v103_v18 = vsub.s32 1, %v98_v15 }
  0x31   :  { %v76_v43 = vld [vmem:[#allocation5 + $0xe8] sm:$0xff]  ;;  %v78_v44 = vld [vmem:[#allocation5 + $0xf8] sm:$0xff]  ;;  %v81_v45 = vld [vmem:[#allocation5 + $0x110] sm:$0xff]  ;;  %v392_v46 = vpack.c.bf16 %v74_v41, %v71_v38  ;;  %v107_v19 = vsub.s32 2, %v98_v15 }
  0x32   :  { %413 = vmatpush3.bf16.msra.mxu1 %v410_v23  ;;  %v77_v47 = vld [vmem:[#allocation5 + $0xf0] sm:$0xff]  ;;  %v422_v48 = vpack.c.bf16 %v76_v43, %v73_v42  ;;  %v43_v49 = vld [vmem:[#allocation2] sm:$0xff]  ;;  %v394_v50 = vpack.c.bf16 %v81_v45, %v78_v44  ;;  %v80_v51 = vld [vmem:[#allocation5 + $0x108] sm:$0xff] }
  0x33   :  { %385 = vmatpush1.bf16.msra.mxu0 %v384_v28  ;;  %415 = vmatprep.subr.bf16.mxu1 %v414_v30  ;;  %v79_v52 = vld [vmem:[#allocation5 + $0x100] sm:$0xff]  ;;  %v82_v53 = vld [vmem:[#allocation5 + $0x118] sm:$0xff]  ;;  %v84_v54 = vld [vmem:[#allocation5 + $0x128] sm:$0xff]  ;;  %v396_v56 = vpack.c.bf16 %v80_v51, %v77_v47 }
  0x34   :  { %387 = vmatprep.subr.bf16.mxu0 %v386_v31  ;;  %368 = vmatprep.mubr.f32.mxu1 %v43_v49  ;;  %v87_v55 = vld [vmem:[#allocation5 + $0x140] sm:$0xff]  ;;  %v426_v58 = vpack.c.bf16 %v82_v53, %v79_v52  ;;  %v86_v60 = vld [vmem:[#allocation5 + $0x138] sm:$0xff]  ;;  %v85_v61 = vld [vmem:[#allocation5 + $0x130] sm:$0xff] }
  0x35   :  { %v83_v57 = vld [vmem:[#allocation5 + $0x120] sm:$0xff]  ;;  %v398_v59 = vpack.c.bf16 %v87_v55, %v84_v54  ;;  %v88_v62 = vld [vmem:[#allocation5 + $0x148] sm:$0xff]  ;;  %v90_v63 = vld [vmem:[#allocation5 + $0x158] sm:$0xff] }
  0x36   :  { %417 = vmatpush3.bf16.msra.mxu1 %v414_v30  ;;  %v93_v1 = vld [vmem:[#allocation5 + $0x170] sm:$0xff]  ;;  %v400_v2 = vpack.c.bf16 %v86_v60, %v83_v57  ;;  %v430_v4 = vpack.c.bf16 %v88_v62, %v85_v61  ;;  %v92_v6 = vld [vmem:[#allocation5 + $0x168] sm:$0xff]  ;;  %v91_v7 = vld [vmem:[#allocation5 + $0x160] sm:$0xff] }
  0x37   :  { %389 = vmatpush1.bf16.msra.mxu0 %v388_v37  ;;  %419 = vmatprep.subr.bf16.mxu1 %v418_v39  ;;  %v89_v3 = vld [vmem:[#allocation5 + $0x150] sm:$0xff]  ;;  %v402_v5 = vpack.c.bf16 %v93_v1, %v90_v63  ;;  %v94_v8 = vld [vmem:[#allocation5 + $0x178] sm:$0xff]  ;;  %v44_v11 = vld [vmem:[#allocation2 + $0x8] sm:$0xff] }
  0x38   :  { %391 = vmatprep.subr.bf16.mxu0 %v390_v40  ;;  %v404_v9 = vpack.c.bf16 %v92_v6, %v89_v3  ;;  %v434_v10 = vpack.c.bf16 %v94_v8, %v91_v7  ;;  %v45_v12 = vld [vmem:[#allocation2 + $0x10] sm:$0xff]  ;;  %v46_v13 = vld [vmem:[#allocation2 + $0x18] sm:$0xff]  ;;  %v95_v17 = vld [vmem:[%s597_s2] sm:$0x7]  ;;  %s525_s2 = smov [#allocation7]  }
  0x39   :  { %v100_v20 = vrot.slane %v95_v17, %v99_v16  ;;  %v104_v21 = vrot.slane %v95_v17, %v103_v18  ;;  %v108_v23 = vrot.slane %v95_v17, %v107_v19  ;;  %s303_s13 = sshll.u32 %s525_s2, 4  ;;  %s304_s13 = int_to_ptr.vmem [resolvable:$true] %s303_s13 }
  0x3a   :  { %421 = vmatpush3.bf16.msra.mxu1 %v418_v39  ;;  %s490_s14 = scalar_lea.vmem %s304_s13, 1536  ;;  %p495_p3 = scmp.lt.s32.totalorder %s304_s13, %s304_s13 }
  0x3b   :  { %393 = vmatpush1.bf16.msra.mxu0 %v392_v46  ;;  %423 = vmatprep.subr.bf16.mxu1 %v422_v48  ;;  %p491_p2 = scmp.ne.s32.totalorder %s304_s13, %s490_s14  ;;  %p496_p4 = scmp.lt.s32.totalorder %s490_s14, %s490_s14 }
  0x3c   :  { %395 = vmatprep.subr.bf16.mxu0 %v394_v50 }
  0x3d   :  { %p497_p5 = por %p496_p4, %p495_p3 }
  0x3e   :  { %425 = vmatpush3.bf16.msra.mxu1 %v422_v48 }
  0x3f   :  { %397 = vmatpush1.bf16.msra.mxu0 %v396_v56  ;;  %427 = vmatprep.subr.bf16.mxu1 %v426_v58  ;;  %p498_p6 = pnand %p497_p5, %p491_p2 }
  0x40   :  { %399 = vmatprep.subr.bf16.mxu0 %v398_v59 }
  0x42   :  { %429 = vmatpush3.bf16.msra.mxu1 %v426_v58 }
  0x43   :  { %401 = vmatpush1.bf16.msra.mxu0 %v400_v2  ;;  %431 = vmatprep.subr.bf16.mxu1 %v430_v4 }
  0x44   :  { %403 = vmatprep.subr.bf16.mxu0 %v402_v5 }
  0x46   :  { %433 = vmatpush3.bf16.msra.mxu1 %v430_v4 }
  0x47   :  { %405 = vmatpush1.bf16.msra.mxu0 %v404_v9  ;;  %435 = vmatprep.subr.bf16.mxu1 %v434_v10 }
  0x4a   :  { %177 = vmatmul.mubr.f32.vlgmr.msra.gmra.mrb[0].mxu0 %v43_v49  ;;  %437 = vmatpush3.bf16.msra.mxu1 %v434_v10 }
  0x4b   :  { %182 = vmatprep.mubr.f32.mxu0 %v524_v0 }
  0x4d   :  { %369 = vmatmul.mubr.f32.vlgmr.msra.gmra.mrb[0].mxu1 %v44_v11 }
  0x4e   :  { %183 = vmatmul.mubr.f32.gmra.mrb[2].mxu0 %v44_v11  ;;  %371 = vmatprep.mubr.f32.mxu1 %v45_v12 }
  0x4f   :  { %188 = vmatprep.mubr.f32.mxu0 %v524_v0 }
  0x51   :  { %372 = vmatmul.mubr.f32.gmra.mrb[2].mxu1 %v46_v13 }
  0x52   :  { %189 = vmatmul.mubr.f32.gmra.mrb[4].mxu0 %v45_v12 }
  0x53   :  { %194 = vmatprep.mubr.f32.mxu0 %v524_v0 }
  0x56   :  { %195 = vmatmul.mubr.f32.gmra.mrb[6].mxu0 %v46_v13 }
 0x11d   :  { %v178_v22 = vpop.f32.mrb[0].mxu0 }
 0x11e   :  { %v179_v24 = vadd.f32 %v178_v22, %v100_v20  ;;  %v180_v25 = vpop.f32.mrb[1].mxu0 }
 0x11f   :  { %v181_v26 = vadd.f32 %v180_v25, %v104_v21 }
 0x120   :  { %286 = vst [vmem:[#allocation7] sm:$0xff] %v179_v24  ;;  %v370_v27 = vpop.f32.mrb[0].mxu1 }
 0x121   :  { %287 = vst [vmem:[#allocation7 + $0x8] sm:$0xff] %v181_v26  ;;  %v184_v0 = vpop.f32.mrb[2].mxu0  ;;  %v273_v28 = vadd.f32 %v370_v27, %v108_v23  ;;  %v267_v29 = vpop.f32.mrb[1].mxu1 }
 0x122   :  { %v185_v30 = vadd.f32 %v184_v0, %v100_v20  ;;  %v186_v31 = vpop.f32.mrb[3].mxu0  ;;  %v268_v32 = vadd.f32 %v267_v29, %v108_v23 }
 0x123   :  { %v187_v33 = vadd.f32 %v186_v31, %v104_v21  ;;  %291 = vst [vmem:[#allocation7 + $0x28] sm:$0xff] %v273_v28 }
 0x124   :  { %289 = vst [vmem:[#allocation7 + $0x18] sm:$0xff] %v185_v30  ;;  %288 = vst [vmem:[#allocation7 + $0x10] sm:$0xff] %v268_v32  ;;  %v373_v34 = vpop.f32.mrb[2].mxu1 }
 0x125   :  { %290 = vst [vmem:[#allocation7 + $0x20] sm:$0xff] %v187_v33  ;;  %v190_v35 = vpop.f32.mrb[4].mxu0  ;;  %v283_v36 = vadd.f32 %v373_v34, %v108_v23  ;;  %v277_v37 = vpop.f32.mrb[3].mxu1 }
 0x126   :  { %v191_v38 = vadd.f32 %v190_v35, %v100_v20  ;;  %v192_v39 = vpop.f32.mrb[5].mxu0  ;;  %v278_v40 = vadd.f32 %v277_v37, %v108_v23 }
 0x127   :  { %v193_v41 = vadd.f32 %v192_v39, %v104_v21  ;;  %297 = vst [vmem:[#allocation7 + $0x58] sm:$0xff] %v283_v36 }
 0x128   :  { %292 = vst [vmem:[#allocation7 + $0x30] sm:$0xff] %v191_v38  ;;  %294 = vst [vmem:[#allocation7 + $0x40] sm:$0xff] %v278_v40 }
 0x129   :  { %293 = vst [vmem:[#allocation7 + $0x38] sm:$0xff] %v193_v41  ;;  %v196_v42 = vpop.f32.mrb[6].mxu0 }
 0x12a   :  { %v197_v43 = vadd.f32 %v196_v42, %v100_v20  ;;  %v198_v44 = vpop.f32.mrb[7].mxu0 }
 0x12b   :  { %v199_v45 = vadd.f32 %v198_v44, %v104_v21 }
 0x12c   :  { %295 = vst [vmem:[#allocation7 + $0x48] sm:$0xff] %v197_v43 }
 0x12d   :  { %296 = vst [vmem:[#allocation7 + $0x50] sm:$0xff] %v199_v45 }
 0x12e   :  { %501 = shalt.err (!%p498_p6)
}
 0x12f   :  { %s502_s17 = scalar_lea.hbm %s598_s3, 1536 }
 0x130   :  { %p503_p7 = scmp.ne.s32.totalorder %s598_s3, %s502_s17  ;;  %p506_p8 = scmp.lt.u32.totalorder %s502_s17, %s598_s3 }
 0x132   :  { %p508_p9 = pnand %p506_p8, %p503_p7 }
 0x134   :  { %511 = shalt.err (!%p508_p9)
}
 0x135   :  { %309 = dma.vmem_to_hbm [thread:$0]  %s304_s13, 1536, %s598_s3, [#allocation4], %s522_s0, %s522_s0, %s523_s9  }
 0x136   :  { %516 = dma.done.wait [#allocation4], 1536  }
 0x137   :  { %517 = vsyncadd [#allocation4], 4294965760 }
 0x138   :  { %313 = vsyncpa [#allocation3], 1 }
 0x139   :  { %314 = vsyncpa [#allocation6], 1 }
 0x13a   :  { %315 = vsyncpa [#allocation4], 1 }

</bundles_post_ra>
